<compile_context>
chip_gen: v7x
topology: tpu7x:2x2x1
jax: 0.10.0
libtpu: 0.0.40
codegen_flags: <defaults>
</compile_context>

<pallas_src>
import jax
import jax.numpy as jnp
from jax.experimental import pallas as pl
from jax.experimental.pallas import tpu as pltpu

LAYER_IN_FEATURES = (1, 2, 4, 8)


def _multilinear_kernel(w_ref, x_ref, o_ref):
    # w_ref: (C, K) fused weights, bias folded into the last column (resident).
    # x_ref: (K, bb) lane-dense batch tile (features on sublanes, batch on lanes).
    # o_ref: (C, bb) lane-dense output tile.
    # Single small MXU pass per tile.  (At K<=16, C=3 a VPU scalar-broadcast FMA
    # loop is an alternative on v5e/v6e; the kernel is HBM-bound either way.)
    o_ref[...] = jnp.dot(
        w_ref[...], x_ref[...], preferred_element_type=jnp.float32
    ).astype(o_ref.dtype)


def multilinear_forward(xs, weights, biases, *, block_b=512):
    """xs: list of 4 arrays (B, F_i); weights: list of (C, F_i) (PyTorch layout);
    biases: list of (C,).  Returns (B, C) float32."""
    assert len(xs) == len(weights) == len(biases)
    B = xs[0].shape[0]
    C = weights[0].shape[0]

    # ---- Fuse the 4 linears into a single contraction (done once, in XLA) ----
    bsum = sum(biases).reshape(C, 1).astype(jnp.float32)
    w_all = jnp.concatenate(
        [w.astype(jnp.float32) for w in weights] + [bsum], axis=1
    )  # (C, K), K = 1 + 2 + 4 + 8 + 1 = 16
    K = w_all.shape[1]
    ones = jnp.ones((1, B), jnp.float32)
    x_all = jnp.concatenate(
        [x.T.astype(jnp.float32) for x in xs] + [ones], axis=0
    )  # (K, B): batch on the lane axis

    # ---- Tile the batch (lane) axis ----
    if B <= block_b:
        bb = B              # single full-dim block: no padding / divisibility issues
        b_pad = B
    else:
        assert block_b % 128 == 0, "block_b must be a multiple of 128"
        bb = block_b
        b_pad = pl.cdiv(B, bb) * bb
        if b_pad != B:
            # Zero-padded batch columns are computed and sliced off afterwards.
            x_all = jnp.pad(x_all, ((0, 0), (0, b_pad - B)))

    grid = (b_pad // bb,)

    out_t = pl.pallas_call(
        _multilinear_kernel,
        out_shape=jax.ShapeDtypeStruct((C, b_pad), jnp.float32),
        grid=grid,
        in_specs=[
            pl.BlockSpec((C, K), lambda i: (0, 0)),    # fused weights: resident
            pl.BlockSpec((K, bb), lambda i: (0, i)),   # batch tile (lane-dense)
        ],
        out_specs=pl.BlockSpec((C, bb), lambda i: (0, i)),
        compiler_params=pltpu.CompilerParams(
            dimension_semantics=("parallel",),         # 2-TC sharding on v7x
        ),
    )(w_all, x_all)

    # Un-transpose only at the boundary to match the PyTorch module's (B, C).
    return out_t[:, :B].T


def init_params(key, out_channels=3):
    """Deterministic synthetic init mimicking nn.Linear: W (out, in), b (out,)."""
    weights, biases = [], []
    for fin in LAYER_IN_FEATURES:
        key, kw, kb = jax.random.split(key, 3)
        bound = 1.0 / jnp.sqrt(jnp.float32(fin))
        w = jax.random.uniform(kw, (out_channels, fin), jnp.float32, -bound, bound)
        b = jax.random.uniform(kb, (out_channels,), jnp.float32, -bound, bound)
        weights.append(w)   # keep native PyTorch (out, in) layout
        biases.append(b)
    return weights, biases


def reference_forward(xs, weights, biases):
    out = None
    for x, w, b in zip(xs, weights, biases):
        y = x @ w.T + b
        out = y if out is None else out + y
    return out


if __name__ == "__main__":
    key = jax.random.PRNGKey(0)
    out_channels = 3

    key, pkey = jax.random.split(key)
    weights, biases = init_params(pkey, out_channels=out_channels)

    # --- Test 1: small batch, single-block path ---
    batch = 8
    xs = []
    for fin in LAYER_IN_FEATURES:
        key, xk = jax.random.split(key)
        xs.append(jax.random.normal(xk, (batch, fin), jnp.float32))

    out = jax.block_until_ready(multilinear_forward(xs, weights, biases))
    ref = reference_forward(xs, weights, biases)
    assert out.shape == (batch, out_channels)
    assert jnp.allclose(out, ref, atol=1e-5, rtol=1e-5)

    # --- Test 2: batch > block -> padded, multi-step pipelined grid ---
    batch2 = 300
    xs2 = []
    for fin in LAYER_IN_FEATURES:
        key, xk = jax.random.split(key)
        xs2.append(jax.random.normal(xk, (batch2, fin), jnp.float32))

    out2 = jax.block_until_ready(
        multilinear_forward(xs2, weights, biases, block_b=128)
    )
    ref2 = reference_forward(xs2, weights, biases)
    assert out2.shape == (batch2, out_channels)
    assert jnp.allclose(out2, ref2, atol=1e-5, rtol=1e-5)

    print("KERNEL_OK")
</pallas_src>

<mosaic_0001>
module attributes {stable_mosaic.version = 11 : i64} {
  func.func @_multilinear_kernel(%arg0: i32, %arg1: memref<3x16xf32, #tpu.memory_space<vmem>>, %arg2: memref<16x8xf32, #tpu.memory_space<vmem>>, %arg3: memref<3x8xf32, #tpu.memory_space<vmem>>) attributes {dimension_semantics = [#tpu.dimension_semantics<parallel>], iteration_bounds = array<i64: 1>, scalar_prefetch = 0 : i64, scratch_operands = 0 : i64, tpu.core_type = #tpu.core_type<tc>, window_params = [{pipeline_mode = #tpu.pipeline_mode<synchronous>, transform_indices = @transform_0, window_bounds = array<i64: 3, 16>}, {transform_indices = @transform_1, window_bounds = array<i64: 16, 8>}, {transform_indices = @transform_2, window_bounds = array<i64: 3, 8>}]} {
    %c0 = arith.constant 0 : index
    %c0_0 = arith.constant 0 : index
    %0 = vector.load %arg1[%c0, %c0_0] : memref<3x16xf32, #tpu.memory_space<vmem>>, vector<3x16xf32>
    %c0_1 = arith.constant 0 : index
    %c0_2 = arith.constant 0 : index
    %1 = vector.load %arg2[%c0_1, %c0_2] : memref<16x8xf32, #tpu.memory_space<vmem>>, vector<16x8xf32>
    %cst = arith.constant dense<0.000000e+00> : vector<3x8xf32>
    %2 = tpu.matmul %0, %1, %cst {dimension_numbers = #tpu.dot_dimension_numbers<[1], [0], [0], [1], [0, 0, 1, 1], [], []>} : vector<3x16xf32>, vector<16x8xf32>, vector<3x8xf32> -> vector<3x8xf32>
    %c0_3 = arith.constant 0 : index
    %c0_4 = arith.constant 0 : index
    %3 = vector.load %arg3[%c0_3, %c0_4] : memref<3x8xf32, #tpu.memory_space<vmem>>, vector<3x8xf32>
    tpu.vector_store %arg3[%c0_3, %c0_4], %2 {strides = array<i32>} : memref<3x8xf32, #tpu.memory_space<vmem>>, vector<3x8xf32>,
    return
  }
  func.func @transform_0(%arg0: i32) -> (i32, i32) {
    %c0_i32 = arith.constant 0 : i32
    %c0_i32_0 = arith.constant 0 : i32
    %c0_i32_1 = arith.constant 0 : i32
    return %c0_i32, %c0_i32_0 : i32, i32
  }
  func.func @transform_1(%arg0: i32) -> (i32, i32) {
    %c0_i32 = arith.constant 0 : i32
    %c0_i32_0 = arith.constant 0 : i32
    return %c0_i32, %arg0 : i32, i32
  }
  func.func @transform_2(%arg0: i32) -> (i32, i32) {
    %c0_i32 = arith.constant 0 : i32
    %c0_i32_0 = arith.constant 0 : i32
    return %c0_i32, %arg0 : i32, i32
  }
}

</mosaic_0001>

<bundles_post_ra>
// kernel: tpu_custom_call.1
= control target key start
LH: loop header
LB: loop body
LE: loop exit
PB: predicated region body
PF: predicated region fallthrough
CT: control target
= control target key end

     0   :  { %v147_v2 = vmov 0.0|0.0   ;;  %vm148_vm0 = vmmov 0   ;;  %v149_v4 = vmov 0.0   ;;  %s187_s0 = inlined_call_operand.vmem [shape: f32[3,16], index: 0, kind: input, shape index: {}]   ;;  %s188_s1 = inlined_call_operand.vmem [shape: f32[16,8], index: 1, kind: input, shape index: {}]   ;;  %s189_s2 = inlined_call_operand.hbm [shape: f32[3,8], index: 2, kind: output, shape index: {}]  }
   0x1   :  { %v13_v0 = vld [vmem:[%s188_s1] sm:$0xff]  ;;  %v14_v1 = vld [vmem:[%s188_s1 + $0x8] sm:$0xff]  ;;  %116 = vmatprep.subr.bf16.mxu0 %v147_v2  ;;  %113 = vmatprep.mubr.msk.f32.mxu0 %vm148_vm0, %v149_v4 }
   0x2   :  { %v117_v3 = vpack.c.bf16 %v14_v1, %v13_v0 }
   0x3   :  { %7 = vsyncpa [#allocation3], 0  ;;  %v12_v5 = vld [vmem:[%s187_s0] sm:$0x7]  ;;  %vm15_vm1 = vcmask 130048   ;;  %s150_s15 = smov [#allocation2]  }
   0x4   :  { %118 = vmatpush3.bf16.msra.mxu0 %v117_v3  ;;  %s97_s16 = sshll.u32 %s150_s15, 4  ;;  %vm89_vm2 = vcmask 59392   ;;  %s98_s16 = int_to_ptr.vmem [resolvable:$true] %s97_s16 }
   0x5   :  { %s123_s1 = scalar_lea.vmem %s98_s16, 64  ;;  %p128_p1 = scmp.lt.s32.totalorder %s98_s16, %s98_s16 }
   0x6   :  { %p124_p0 = scmp.ne.s32.totalorder %s98_s16, %s123_s1  ;;  %p129_p2 = scmp.lt.s32.totalorder %s123_s1, %s123_s1 }
   0x7   :  { %114 = vmatmul.mubr.msk.f32.vlgmr.msra.gmra.mrb[0].mxu0 %vm15_vm1, %v12_v5 }
   0x8   :  { %p130_p3 = por %p129_p2, %p128_p1 }
   0xa   :  { %p131_p4 = pnand %p130_p3, %p124_p0 }
  0xda   :  { %v85_v6 = vpop.f32.mrb[0].mxu0 }
  0xdb   :  { %90 = vst.msk [vmem:[#allocation2] sm:$0x7] %vm89_vm2, %v85_v6  ;;  %v115_v7 = vpop.f32.mrb[1].mxu0 }
  0xdc   :  { %134 = shalt.err (!%p131_p4)
}
  0xdd   :  { %s135_s0 = scalar_lea.hbm %s189_s2, 64 }
  0xde   :  { %p136_p5 = scmp.ne.s32.totalorder %s189_s2, %s135_s0  ;;  %p139_p6 = scmp.lt.u32.totalorder %s135_s0, %s189_s2 }
  0xe0   :  { %p141_p7 = pnand %p139_p6, %p136_p5 }
  0xe2   :  { %144 = shalt.err (!%p141_p7)
}
  0xe3   :  { %100 = dma.vmem_to_hbm [thread:$0]  %s98_s16, 64, %s189_s2, [#allocation3]  }
  0xe4   :  { %145 = dma.done.wait [#allocation3], 64  }
  0xe5   :  { %146 = vsyncadd [#allocation3], 4294967232 }
  0xe6   :  { %104 = vsyncpa [#allocation3], 1 }

</bundles_post_ra>
